<compile_context>
chip_gen: v7x
topology: tpu7x:2x2x1
jax: 0.10.0
libtpu: 0.0.40
codegen_flags: <defaults>
</compile_context>

<pallas_src>
import functools

import jax
import jax.numpy as jnp
import numpy as np
from jax import lax
from jax.experimental import pallas as pl
from jax.experimental.pallas import tpu as pltpu


# ---------------------------------------------------------------------------
# Kernel: one grid step == one (batch_tile, t_chunk) chunk of the recurrence.
# h/c are carried across time chunks in VMEM scratch and across the inner
# (unrolled) time loop in vregs.
# ---------------------------------------------------------------------------
def _lstm_kernel(x_ref, h0_ref, c0_ref, wh_ref, wx_ref, b_ref, out_ref,
                 h_scr, c_scr, zx_scr, *, hidden_dim, t_chunk, batch_tile):
    H = hidden_dim
    B = batch_tile

    # (Re-)initialize the carried state at the start of each batch tile's time
    # loop (time-chunk axis is the inner, sequential grid axis).
    @pl.when(pl.program_id(1) == 0)
    def _():
        h_scr[...] = h0_ref[...]
        c_scr[...] = c0_ref[...]

    # ---- fused, time-parallel input projection for the whole chunk ---------
    # One (t_chunk*B, E) @ (E, 4H) bf16 matmul, f32 accumulation, bias folded.
    # The leading-dim collapse / split reshapes are layout no-ops on TPU
    # (last dim unchanged, sublane-tile regrouping only).
    x2d = x_ref[...].reshape(t_chunk * B, -1).astype(jnp.bfloat16)
    zx = jnp.dot(x2d, wx_ref[...],
                 preferred_element_type=jnp.float32) + b_ref[...]
    zx_scr[...] = zx.reshape(t_chunk, B, 4 * H)

    wh = wh_ref[...]                    # (H, 4H) bf16, loaded once per chunk
    h = h_scr[...]                      # (B, H) f32
    c = c_scr[...]                      # (B, H) f32

    def step(tl, h, c):
        # Only the recurrent h @ Wh matmul + gate elementwise math sit on the
        # serial critical path; the x projection was hoisted above.
        z = zx_scr[tl] + jnp.dot(h.astype(jnp.bfloat16), wh,
                                 preferred_element_type=jnp.float32)
        f = jax.nn.sigmoid(z[:, 0 * H:1 * H])
        i = jax.nn.sigmoid(z[:, 1 * H:2 * H])
        o = jax.nn.sigmoid(z[:, 2 * H:3 * H])
        c_tilda = jnp.tanh(z[:, 3 * H:4 * H])
        c = f * c + i * c_tilda
        h = o * jnp.tanh(c)
        out_ref[tl] = h
        return h, c

    if t_chunk <= 8:
        # Small chunk: full static unroll (max LLO scheduler visibility).
        for tl in range(t_chunk):
            h, c = step(tl, h, c)
    else:
        # Production-sized chunk: moderate unroll to avoid code-size /
        # live-range blowup while keeping scheduler visibility.
        h, c = lax.fori_loop(0, t_chunk, lambda tl, hc: step(tl, *hc),
                             (h, c), unroll=4)

    h_scr[...] = h
    c_scr[...] = c


# ---------------------------------------------------------------------------
# VMEM-budgeted chunk-size selection.
# ---------------------------------------------------------------------------
def _chunk_vmem_bytes(t_chunk, batch_tile, E, H):
    """Approximate per-grid-step VMEM footprint in bytes."""
    x_blk = t_chunk * batch_tile * E * 4            # f32 input block
    out_blk = t_chunk * batch_tile * H * 4          # f32 output block
    zx_scr = t_chunk * batch_tile * 4 * H * 4       # f32 Zx scratch
    weights = (H + E) * 4 * H * 2 + 4 * H * 4       # bf16 Wh/Wx (1-buf) + f32 bias
    state = 4 * batch_tile * H * 4                  # h0/c0 blocks + h/c scratch
    return 2 * (x_blk + out_blk) + zx_scr + weights + state


def _pick_t_chunk(L, batch_tile, E, H, budget_bytes):
    t = L
    while t > 1 and (L % t != 0
                     or _chunk_vmem_bytes(t, batch_tile, E, H) > budget_bytes):
        t -= 1
    return t


# ---------------------------------------------------------------------------
# Wrapper.
# ---------------------------------------------------------------------------
def lstm_forward(x, h0, c0, wh, wx, b, *, batch_tile=None, t_chunk=None,
                 vmem_budget_bytes=24 * 2**20):
    """
    x  : (L, B, E) f32
    h0 : (B, H)    f32
    c0 : (B, H)    f32
    wh : (H, 4H)   f32   hidden part of stacked gate weights (gate order [f,i,o,c])
    wx : (E, 4H)   f32   input  part of stacked gate weights
    b  : (1, 4H)   f32   stacked gate bias
    returns h_sequence : (L, B, H) f32

    batch_tile: rows per batch tile (default: whole batch).  On v7x, pass
    batch_tile = B // 2 so the "parallel" batch grid axis spans both TensorCores.
    """
    L, B, E = x.shape
    H = h0.shape[1]

    if batch_tile is None:
        batch_tile = B
    assert B % batch_tile == 0
    nb = B // batch_tile

    if t_chunk is None:
        t_chunk = _pick_t_chunk(L, batch_tile, E, H, vmem_budget_bytes)
    assert L % t_chunk == 0, "t_chunk must divide the sequence length"

    vmem_est = _chunk_vmem_bytes(t_chunk, batch_tile, E, H)
    vmem_limit = int(min(max(2 * vmem_est, 16 * 2**20), 48 * 2**20))

    # bf16 MXU weights (f32 accumulation happens in-kernel); activations,
    # bias and state stay f32.
    wh_bf16 = wh.astype(jnp.bfloat16)
    wx_bf16 = wx.astype(jnp.bfloat16)

    kernel = functools.partial(_lstm_kernel, hidden_dim=H, t_chunk=t_chunk,
                               batch_tile=batch_tile)

    single_buf = pl.Buffered(1)   # loop-invariant inputs: no double-buffering

    cost = pl.CostEstimate(
        flops=8 * L * B * H * (E + H),            # x@Wx + h@Wh per step
        transcendentals=5 * L * B * H,            # 3 sigmoid + 2 tanh per element
        bytes_accessed=(L * B * E * 4 + (H + E) * 4 * H * 2 + 4 * H * 4
                        + 2 * B * H * 4 + L * B * H * 4),
    )

    return pl.pallas_call(
        kernel,
        out_shape=jax.ShapeDtypeStruct((L, B, H), jnp.float32),
        grid_spec=pltpu.PrefetchScalarGridSpec(
            num_scalar_prefetch=0,
            grid=(nb, L // t_chunk),      # (batch tiles, time chunks)
            in_specs=[
                pl.BlockSpec((t_chunk, batch_tile, E),
                             lambda bt, tc: (tc, bt, 0)),                   # x chunk
                pl.BlockSpec((batch_tile, H), lambda bt, tc: (bt, 0),
                             pipeline_mode=single_buf),                     # h0
                pl.BlockSpec((batch_tile, H), lambda bt, tc: (bt, 0),
                             pipeline_mode=single_buf),                     # c0
                pl.BlockSpec((H, 4 * H), lambda bt, tc: (0, 0),
                             pipeline_mode=single_buf),                     # Wh
                pl.BlockSpec((E, 4 * H), lambda bt, tc: (0, 0),
                             pipeline_mode=single_buf),                     # Wx
                pl.BlockSpec((1, 4 * H), lambda bt, tc: (0, 0),
                             pipeline_mode=single_buf),                     # bias
            ],
            out_specs=pl.BlockSpec((t_chunk, batch_tile, H),
                                   lambda bt, tc: (tc, bt, 0)),
            scratch_shapes=[
                pltpu.VMEM((batch_tile, H), jnp.float32),                   # h carry
                pltpu.VMEM((batch_tile, H), jnp.float32),                   # c carry
                pltpu.VMEM((t_chunk, batch_tile, 4 * H), jnp.float32),      # Zx chunk
            ],
        ),
        compiler_params=pltpu.CompilerParams(
            # batch tiles are independent (shardable across cores); the time
            # chunk axis is a true recurrence -> must run sequentially.
            dimension_semantics=("parallel", "arbitrary"),
            vmem_limit_bytes=vmem_limit,
        ),
        cost_estimate=cost,
    )(x, h0, c0, wh_bf16, wx_bf16, b)


# ---------------------------------------------------------------------------
# Pure-JAX references.
# ---------------------------------------------------------------------------
def lstm_reference(x, h0, c0, wh, wx, b):
    """Exact f32 reference (lax.scan) matching the PyTorch forward."""
    H = h0.shape[1]

    def step(carry, x_t):
        h, c = carry
        z = h @ wh + x_t @ wx + b
        f = jax.nn.sigmoid(z[:, 0 * H:1 * H])
        i = jax.nn.sigmoid(z[:, 1 * H:2 * H])
        o = jax.nn.sigmoid(z[:, 2 * H:3 * H])
        c_t = jnp.tanh(z[:, 3 * H:4 * H])
        c = f * c + i * c_t
        h = o * jnp.tanh(c)
        return (h, c), h

    (_, _), hs = lax.scan(step, (h0, c0), x)
    return hs


def lstm_reference_bf16(x, h0, c0, wh, wx, b):
    """Reference that mimics the kernel's bf16-input / f32-accumulate matmuls."""
    H = h0.shape[1]
    wh_bf = wh.astype(jnp.bfloat16)
    wx_bf = wx.astype(jnp.bfloat16)

    def step(carry, x_t):
        h, c = carry
        z = (jnp.dot(x_t.astype(jnp.bfloat16), wx_bf,
                     preferred_element_type=jnp.float32) + b
             + jnp.dot(h.astype(jnp.bfloat16), wh_bf,
                       preferred_element_type=jnp.float32))
        f = jax.nn.sigmoid(z[:, 0 * H:1 * H])
        i = jax.nn.sigmoid(z[:, 1 * H:2 * H])
        o = jax.nn.sigmoid(z[:, 2 * H:3 * H])
        c_t = jnp.tanh(z[:, 3 * H:4 * H])
        c = f * c + i * c_t
        h = o * jnp.tanh(c)
        return (h, c), h

    (_, _), hs = lax.scan(step, (h0, c0), x)
    return hs


if __name__ == "__main__":
    # Small shapes consistent with the module (length, batch, embed, hidden).
    L, B, E, H = 8, 8, 16, 32

    key = jax.random.PRNGKey(0)
    k_x, k_h, k_c, k_wf, k_wi, k_wo, k_wc, k_b = jax.random.split(key, 8)

    # PyTorch layout: each W* is Linear(E+H, H) applied to hx = cat([h, x]).
    fan_in = E + H
    bound = 1.0 / np.sqrt(fan_in)

    def init_w(k):
        return jax.random.uniform(k, (H, fan_in), jnp.float32, -bound, bound)

    Wf, Wi, Wo, Wc = init_w(k_wf), init_w(k_wi), init_w(k_wo), init_w(k_wc)
    bias = jax.random.uniform(k_b, (4 * H,), jnp.float32, -bound, bound)

    # Pre-pack: stack gates along the output dim (order [f,i,o,c]), split hx
    # into the h-part (first H cols) and x-part (next E cols), transpose so the
    # kernel computes h @ Wh + x @ Wx + b with no in-kernel concat.
    W_all = jnp.concatenate([Wf, Wi, Wo, Wc], axis=0)   # (4H, H+E)
    wh = W_all[:, :H].T                                 # (H, 4H)
    wx = W_all[:, H:].T                                 # (E, 4H)
    b = bias.reshape(1, 4 * H)                          # (1, 4H)

    x = jax.random.normal(k_x, (L, B, E), jnp.float32)
    h0 = jax.random.normal(k_h, (B, H), jnp.float32)
    c0 = jax.random.normal(k_c, (B, H), jnp.float32)

    out = jax.block_until_ready(lstm_forward(x, h0, c0, wh, wx, b))
    assert out.shape == (L, B, H), out.shape

    # Tight check against a reference with the same bf16 matmul quantization.
    ref_q = jax.block_until_ready(lstm_reference_bf16(x, h0, c0, wh, wx, b))
    np.testing.assert_allclose(np.asarray(out), np.asarray(ref_q),
                               atol=5e-3, rtol=5e-3)

    # Loose check against the exact-f32 PyTorch semantics (bound on the
    # bf16 weight-quantization error).
    ref = jax.block_until_ready(lstm_reference(x, h0, c0, wh, wx, b))
    np.testing.assert_allclose(np.asarray(out), np.asarray(ref),
                               atol=5e-2, rtol=5e-2)

    print("KERNEL_OK")
</pallas_src>

<mosaic_0001>
module attributes {stable_mosaic.version = 11 : i64} {
  func.func @_lstm_kernel(%arg0: i32, %arg1: i32, %arg2: memref<8x8x16xf32, #tpu.memory_space<vmem>>, %arg3: memref<8x32xf32, #tpu.memory_space<vmem>>, %arg4: memref<8x32xf32, #tpu.memory_space<vmem>>, %arg5: memref<32x128xbf16, #tpu.memory_space<vmem>>, %arg6: memref<16x128xbf16, #tpu.memory_space<vmem>>, %arg7: memref<1x128xf32, #tpu.memory_space<vmem>>, %arg8: memref<8x8x32xf32, #tpu.memory_space<vmem>>, %arg9: memref<8x32xf32, #tpu.memory_space<vmem>>, %arg10: memref<8x32xf32, #tpu.memory_space<vmem>>, %arg11: memref<8x8x128xf32, #tpu.memory_space<vmem>>) attributes {dimension_semantics = [#tpu.dimension_semantics<parallel>, #tpu.dimension_semantics<arbitrary>], iteration_bounds = array<i64: 1, 1>, scalar_prefetch = 0 : i64, scratch_operands = 3 : i64, tpu.core_type = #tpu.core_type<tc>, window_params = [{transform_indices = @transform_0, window_bounds = array<i64: 8, 8, 16>}, {pipeline_mode = #tpu.pipeline_mode<synchronous>, transform_indices = @transform_1, window_bounds = array<i64: 8, 32>}, {pipeline_mode = #tpu.pipeline_mode<synchronous>, transform_indices = @transform_2, window_bounds = array<i64: 8, 32>}, {pipeline_mode = #tpu.pipeline_mode<synchronous>, transform_indices = @transform_3, window_bounds = array<i64: 32, 128>}, {pipeline_mode = #tpu.pipeline_mode<synchronous>, transform_indices = @transform_4, window_bounds = array<i64: 16, 128>}, {pipeline_mode = #tpu.pipeline_mode<synchronous>, transform_indices = @transform_5, window_bounds = array<i64: 1, 128>}, {transform_indices = @transform_6, window_bounds = array<i64: 8, 8, 32>}]} {
    %c0_i32 = arith.constant 0 : i32
    %0 = arith.cmpi eq, %arg1, %c0_i32 : i32
    %1 = arith.extui %0 : i1 to i32
    %c0_i32_0 = arith.constant 0 : i32
    %2 = arith.cmpi ne, %1, %c0_i32_0 : i32
    scf.if %2 {
      %c0_93 = arith.constant 0 : index
      %c0_94 = arith.constant 0 : index
      %282 = vector.load %arg3[%c0_93, %c0_94] : memref<8x32xf32, #tpu.memory_space<vmem>>, vector<8x32xf32>
      %c0_95 = arith.constant 0 : index
      %c0_96 = arith.constant 0 : index
      %283 = vector.load %arg9[%c0_95, %c0_96] : memref<8x32xf32, #tpu.memory_space<vmem>>, vector<8x32xf32>
      tpu.vector_store %arg9[%c0_95, %c0_96], %282 {strides = array<i32>} : memref<8x32xf32, #tpu.memory_space<vmem>>, vector<8x32xf32>,
      %c0_97 = arith.constant 0 : index
      %c0_98 = arith.constant 0 : index
      %284 = vector.load %arg4[%c0_97, %c0_98] : memref<8x32xf32, #tpu.memory_space<vmem>>, vector<8x32xf32>
      %c0_99 = arith.constant 0 : index
      %c0_100 = arith.constant 0 : index
      %285 = vector.load %arg10[%c0_99, %c0_100] : memref<8x32xf32, #tpu.memory_space<vmem>>, vector<8x32xf32>
      tpu.vector_store %arg10[%c0_99, %c0_100], %284 {strides = array<i32>} : memref<8x32xf32, #tpu.memory_space<vmem>>, vector<8x32xf32>,
    } else {
    }
    %c0 = arith.constant 0 : index
    %c0_1 = arith.constant 0 : index
    %c0_2 = arith.constant 0 : index
    %3 = vector.load %arg2[%c0, %c0_1, %c0_2] : memref<8x8x16xf32, #tpu.memory_space<vmem>>, vector<8x8x16xf32>
    %4 = vector.shape_cast %3 : vector<8x8x16xf32> to vector<64x16xf32>
    %5 = arith.truncf %4 : vector<64x16xf32> to vector<64x16xbf16>
    %c0_3 = arith.constant 0 : index
    %c0_4 = arith.constant 0 : index
    %6 = vector.load %arg6[%c0_3, %c0_4] : memref<16x128xbf16, #tpu.memory_space<vmem>>, vector<16x128xbf16>
    %cst = arith.constant dense<0.000000e+00> : vector<64x128xf32>
    %7 = tpu.matmul %5, %6, %cst {dimension_numbers = #tpu.dot_dimension_numbers<[1], [0], [0], [1], [0, 0, 1, 1], [], []>} : vector<64x16xbf16>, vector<16x128xbf16>, vector<64x128xf32> -> vector<64x128xf32>
    %c0_5 = arith.constant 0 : index
    %c0_6 = arith.constant 0 : index
    %8 = vector.load %arg7[%c0_5, %c0_6] : memref<1x128xf32, #tpu.memory_space<vmem>>, vector<1x128xf32>
    %9 = vector.broadcast %8 : vector<1x128xf32> to vector<64x128xf32>
    %10 = arith.addf %7, %9 : vector<64x128xf32>
    %11 = vector.shape_cast %10 : vector<64x128xf32> to vector<8x8x128xf32>
    %c0_7 = arith.constant 0 : index
    %c0_8 = arith.constant 0 : index
    %c0_9 = arith.constant 0 : index
    %12 = vector.load %arg11[%c0_7, %c0_8, %c0_9] : memref<8x8x128xf32, #tpu.memory_space<vmem>>, vector<8x8x128xf32>
    tpu.vector_store %arg11[%c0_7, %c0_8, %c0_9], %11 {strides = array<i32>} : memref<8x8x128xf32, #tpu.memory_space<vmem>>, vector<8x8x128xf32>,
    %c0_10 = arith.constant 0 : index
    %c0_11 = arith.constant 0 : index
    %13 = vector.load %arg5[%c0_10, %c0_11] : memref<32x128xbf16, #tpu.memory_space<vmem>>, vector<32x128xbf16>
    %c0_12 = arith.constant 0 : index
    %c0_13 = arith.constant 0 : index
    %14 = vector.load %arg9[%c0_12, %c0_13] : memref<8x32xf32, #tpu.memory_space<vmem>>, vector<8x32xf32>
    %c0_14 = arith.constant 0 : index
    %c0_15 = arith.constant 0 : index
    %15 = vector.load %arg10[%c0_14, %c0_15] : memref<8x32xf32, #tpu.memory_space<vmem>>, vector<8x32xf32>
    %c0_16 = arith.constant 0 : index
    %c0_17 = arith.constant 0 : index
    %c0_18 = arith.constant 0 : index
    %16 = vector.load %arg11[%c0_16, %c0_17, %c0_18] : memref<8x8x128xf32, #tpu.memory_space<vmem>>, vector<1x8x128xf32>
    %17 = vector.shape_cast %16 : vector<1x8x128xf32> to vector<8x128xf32>
    %18 = arith.truncf %14 : vector<8x32xf32> to vector<8x32xbf16>
    %cst_19 = arith.constant dense<0.000000e+00> : vector<8x128xf32>
    %19 = tpu.matmul %18, %13, %cst_19 {dimension_numbers = #tpu.dot_dimension_numbers<[1], [0], [0], [1], [0, 0, 1, 1], [], []>} : vector<8x32xbf16>, vector<32x128xbf16>, vector<8x128xf32> -> vector<8x128xf32>
    %20 = arith.addf %17, %19 : vector<8x128xf32>
    %21 = vector.extract_strided_slice %20 {offsets = [0, 0], sizes = [8, 32], strides = [1, 1]} : vector<8x128xf32> to vector<8x32xf32>
    %22 = arith.negf %21 : vector<8x32xf32>
    %23 = math.exp %22 : vector<8x32xf32>
    %cst_20 = arith.constant 1.000000e+00 : f32
    %24 = vector.broadcast %cst_20 : f32 to vector<8x32xf32>
    %25 = arith.addf %24, %23 : vector<8x32xf32>
    %26 = arith.divf %24, %25 : vector<8x32xf32>
    %27 = vector.extract_strided_slice %20 {offsets = [0, 32], sizes = [8, 32], strides = [1, 1]} : vector<8x128xf32> to vector<8x32xf32>
    %28 = arith.negf %27 : vector<8x32xf32>
    %29 = math.exp %28 : vector<8x32xf32>
    %cst_21 = arith.constant 1.000000e+00 : f32
    %30 = vector.broadcast %cst_21 : f32 to vector<8x32xf32>
    %31 = arith.addf %30, %29 : vector<8x32xf32>
    %32 = arith.divf %30, %31 : vector<8x32xf32>
    %33 = vector.extract_strided_slice %20 {offsets = [0, 64], sizes = [8, 32], strides = [1, 1]} : vector<8x128xf32> to vector<8x32xf32>
    %34 = arith.negf %33 : vector<8x32xf32>
    %35 = math.exp %34 : vector<8x32xf32>
    %cst_22 = arith.constant 1.000000e+00 : f32
    %36 = vector.broadcast %cst_22 : f32 to vector<8x32xf32>
    %37 = arith.addf %36, %35 : vector<8x32xf32>
    %38 = arith.divf %36, %37 : vector<8x32xf32>
    %39 = vector.extract_strided_slice %20 {offsets = [0, 96], sizes = [8, 32], strides = [1, 1]} : vector<8x128xf32> to vector<8x32xf32>
    %40 = math.tanh %39 : vector<8x32xf32>
    %41 = arith.mulf %26, %15 : vector<8x32xf32>
    %42 = arith.mulf %32, %40 : vector<8x32xf32>
    %43 = arith.addf %41, %42 : vector<8x32xf32>
    %44 = math.tanh %43 : vector<8x32xf32>
    %45 = arith.mulf %38, %44 : vector<8x32xf32>
    %c0_23 = arith.constant 0 : index
    %c0_24 = arith.constant 0 : index
    %c0_25 = arith.constant 0 : index
    %46 = vector.load %arg8[%c0_23, %c0_24, %c0_25] : memref<8x8x32xf32, #tpu.memory_space<vmem>>, vector<1x8x32xf32>
    %47 = vector.shape_cast %46 : vector<1x8x32xf32> to vector<8x32xf32>
    %48 = vector.shape_cast %45 : vector<8x32xf32> to vector<1x8x32xf32>
    tpu.vector_store %arg8[%c0_23, %c0_24, %c0_25], %48 {strides = array<i32>} : memref<8x8x32xf32, #tpu.memory_space<vmem>>, vector<1x8x32xf32>,
    %c1 = arith.constant 1 : index
    %c0_26 = arith.constant 0 : index
    %c0_27 = arith.constant 0 : index
    %49 = vector.load %arg11[%c1, %c0_26, %c0_27] : memref<8x8x128xf32, #tpu.memory_space<vmem>>, vector<1x8x128xf32>
    %50 = vector.shape_cast %49 : vector<1x8x128xf32> to vector<8x128xf32>
    %51 = arith.truncf %45 : vector<8x32xf32> to vector<8x32xbf16>
    %cst_28 = arith.constant dense<0.000000e+00> : vector<8x128xf32>
    %52 = tpu.matmul %51, %13, %cst_28 {dimension_numbers = #tpu.dot_dimension_numbers<[1], [0], [0], [1], [0, 0, 1, 1], [], []>} : vector<8x32xbf16>, vector<32x128xbf16>, vector<8x128xf32> -> vector<8x128xf32>
    %53 = arith.addf %50, %52 : vector<8x128xf32>
    %54 = vector.extract_strided_slice %53 {offsets = [0, 0], sizes = [8, 32], strides = [1, 1]} : vector<8x128xf32> to vector<8x32xf32>
    %55 = arith.negf %54 : vector<8x32xf32>
    %56 = math.exp %55 : vector<8x32xf32>
    %cst_29 = arith.constant 1.000000e+00 : f32
    %57 = vector.broadcast %cst_29 : f32 to vector<8x32xf32>
    %58 = arith.addf %57, %56 : vector<8x32xf32>
    %59 = arith.divf %57, %58 : vector<8x32xf32>
    %60 = vector.extract_strided_slice %53 {offsets = [0, 32], sizes = [8, 32], strides = [1, 1]} : vector<8x128xf32> to vector<8x32xf32>
    %61 = arith.negf %60 : vector<8x32xf32>
    %62 = math.exp %61 : vector<8x32xf32>
    %cst_30 = arith.constant 1.000000e+00 : f32
    %63 = vector.broadcast %cst_30 : f32 to vector<8x32xf32>
    %64 = arith.addf %63, %62 : vector<8x32xf32>
    %65 = arith.divf %63, %64 : vector<8x32xf32>
    %66 = vector.extract_strided_slice %53 {offsets = [0, 64], sizes = [8, 32], strides = [1, 1]} : vector<8x128xf32> to vector<8x32xf32>
    %67 = arith.negf %66 : vector<8x32xf32>
    %68 = math.exp %67 : vector<8x32xf32>
    %cst_31 = arith.constant 1.000000e+00 : f32
    %69 = vector.broadcast %cst_31 : f32 to vector<8x32xf32>
    %70 = arith.addf %69, %68 : vector<8x32xf32>
    %71 = arith.divf %69, %70 : vector<8x32xf32>
    %72 = vector.extract_strided_slice %53 {offsets = [0, 96], sizes = [8, 32], strides = [1, 1]} : vector<8x128xf32> to vector<8x32xf32>
    %73 = math.tanh %72 : vector<8x32xf32>
    %74 = arith.mulf %59, %43 : vector<8x32xf32>
    %75 = arith.mulf %65, %73 : vector<8x32xf32>
    %76 = arith.addf %74, %75 : vector<8x32xf32>
    %77 = math.tanh %76 : vector<8x32xf32>
    %78 = arith.mulf %71, %77 : vector<8x32xf32>
    %c1_32 = arith.constant 1 : index
    %c0_33 = arith.constant 0 : index
    %c0_34 = arith.constant 0 : index
    %79 = vector.load %arg8[%c1_32, %c0_33, %c0_34] : memref<8x8x32xf32, #tpu.memory_space<vmem>>, vector<1x8x32xf32>
    %80 = vector.shape_cast %79 : vector<1x8x32xf32> to vector<8x32xf32>
    %81 = vector.shape_cast %78 : vector<8x32xf32> to vector<1x8x32xf32>
    tpu.vector_store %arg8[%c1_32, %c0_33, %c0_34], %81 {strides = array<i32>} : memref<8x8x32xf32, #tpu.memory_space<vmem>>, vector<1x8x32xf32>,
    %c2 = arith.constant 2 : index
    %c0_35 = arith.constant 0 : index
    %c0_36 = arith.constant 0 : index
    %82 = vector.load %arg11[%c2, %c0_35, %c0_36] : memref<8x8x128xf32, #tpu.memory_space<vmem>>, vector<1x8x128xf32>
    %83 = vector.shape_cast %82 : vector<1x8x128xf32> to vector<8x128xf32>
    %84 = arith.truncf %78 : vector<8x32xf32> to vector<8x32xbf16>
    %cst_37 = arith.constant dense<0.000000e+00> : vector<8x128xf32>
    %85 = tpu.matmul %84, %13, %cst_37 {dimension_numbers = #tpu.dot_dimension_numbers<[1], [0], [0], [1], [0, 0, 1, 1], [], []>} : vector<8x32xbf16>, vector<32x128xbf16>, vector<8x128xf32> -> vector<8x128xf32>
    %86 = arith.addf %83, %85 : vector<8x128xf32>
    %87 = vector.extract_strided_slice %86 {offsets = [0, 0], sizes = [8, 32], strides = [1, 1]} : vector<8x128xf32> to vector<8x32xf32>
    %88 = arith.negf %87 : vector<8x32xf32>
    %89 = math.exp %88 : vector<8x32xf32>
    %cst_38 = arith.constant 1.000000e+00 : f32
    %90 = vector.broadcast %cst_38 : f32 to vector<8x32xf32>
    %91 = arith.addf %90, %89 : vector<8x32xf32>
    %92 = arith.divf %90, %91 : vector<8x32xf32>
    %93 = vector.extract_strided_slice %86 {offsets = [0, 32], sizes = [8, 32], strides = [1, 1]} : vector<8x128xf32> to vector<8x32xf32>
    %94 = arith.negf %93 : vector<8x32xf32>
    %95 = math.exp %94 : vector<8x32xf32>
    %cst_39 = arith.constant 1.000000e+00 : f32
    %96 = vector.broadcast %cst_39 : f32 to vector<8x32xf32>
    %97 = arith.addf %96, %95 : vector<8x32xf32>
    %98 = arith.divf %96, %97 : vector<8x32xf32>
    %99 = vector.extract_strided_slice %86 {offsets = [0, 64], sizes = [8, 32], strides = [1, 1]} : vector<8x128xf32> to vector<8x32xf32>
    %100 = arith.negf %99 : vector<8x32xf32>
    %101 = math.exp %100 : vector<8x32xf32>
    %cst_40 = arith.constant 1.000000e+00 : f32
    %102 = vector.broadcast %cst_40 : f32 to vector<8x32xf32>
    %103 = arith.addf %102, %101 : vector<8x32xf32>
    %104 = arith.divf %102, %103 : vector<8x32xf32>
    %105 = vector.extract_strided_slice %86 {offsets = [0, 96], sizes = [8, 32], strides = [1, 1]} : vector<8x128xf32> to vector<8x32xf32>
    %106 = math.tanh %105 : vector<8x32xf32>
    %107 = arith.mulf %92, %76 : vector<8x32xf32>
    %108 = arith.mulf %98, %106 : vector<8x32xf32>
    %109 = arith.addf %107, %108 : vector<8x32xf32>
    %110 = math.tanh %109 : vector<8x32xf32>
    %111 = arith.mulf %104, %110 : vector<8x32xf32>
    %c2_41 = arith.constant 2 : index
    %c0_42 = arith.constant 0 : index
    %c0_43 = arith.constant 0 : index
    %112 = vector.load %arg8[%c2_41, %c0_42, %c0_43] : memref<8x8x32xf32, #tpu.memory_space<vmem>>, vector<1x8x32xf32>
    %113 = vector.shape_cast %112 : vector<1x8x32xf32> to vector<8x32xf32>
    %114 = vector.shape_cast %111 : vector<8x32xf32> to vector<1x8x32xf32>
    tpu.vector_store %arg8[%c2_41, %c0_42, %c0_43], %114 {strides = array<i32>} : memref<8x8x32xf32, #tpu.memory_space<vmem>>, vector<1x8x32xf32>,
    %c3 = arith.constant 3 : index
    %c0_44 = arith.constant 0 : index
    %c0_45 = arith.constant 0 : index
    %115 = vector.load %arg11[%c3, %c0_44, %c0_45] : memref<8x8x128xf32, #tpu.memory_space<vmem>>, vector<1x8x128xf32>
    %116 = vector.shape_cast %115 : vector<1x8x128xf32> to vector<8x128xf32>
    %117 = arith.truncf %111 : vector<8x32xf32> to vector<8x32xbf16>
    %cst_46 = arith.constant dense<0.000000e+00> : vector<8x128xf32>
    %118 = tpu.matmul %117, %13, %cst_46 {dimension_numbers = #tpu.dot_dimension_numbers<[1], [0], [0], [1], [0, 0, 1, 1], [], []>} : vector<8x32xbf16>, vector<32x128xbf16>, vector<8x128xf32> -> vector<8x128xf32>
    %119 = arith.addf %116, %118 : vector<8x128xf32>
    %120 = vector.extract_strided_slice %119 {offsets = [0, 0], sizes = [8, 32], strides = [1, 1]} : vector<8x128xf32> to vector<8x32xf32>
    %121 = arith.negf %120 : vector<8x32xf32>
    %122 = math.exp %121 : vector<8x32xf32>
    %cst_47 = arith.constant 1.000000e+00 : f32
    %123 = vector.broadcast %cst_47 : f32 to vector<8x32xf32>
    %124 = arith.addf %123, %122 : vector<8x32xf32>
    %125 = arith.divf %123, %124 : vector<8x32xf32>
    %126 = vector.extract_strided_slice %119 {offsets = [0, 32], sizes = [8, 32], strides = [1, 1]} : vector<8x128xf32> to vector<8x32xf32>
    %127 = arith.negf %126 : vector<8x32xf32>
    %128 = math.exp %127 : vector<8x32xf32>
    %cst_48 = arith.constant 1.000000e+00 : f32
    %129 = vector.broadcast %cst_48 : f32 to vector<8x32xf32>
    %130 = arith.addf %129, %128 : vector<8x32xf32>
    %131 = arith.divf %129, %130 : vector<8x32xf32>
    %132 = vector.extract_strided_slice %119 {offsets = [0, 64], sizes = [8, 32], strides = [1, 1]} : vector<8x128xf32> to vector<8x32xf32>
    %133 = arith.negf %132 : vector<8x32xf32>
    %134 = math.exp %133 : vector<8x32xf32>
    %cst_49 = arith.constant 1.000000e+00 : f32
    %135 = vector.broadcast %cst_49 : f32 to vector<8x32xf32>
    %136 = arith.addf %135, %134 : vector<8x32xf32>
    %137 = arith.divf %135, %136 : vector<8x32xf32>
    %138 = vector.extract_strided_slice %119 {offsets = [0, 96], sizes = [8, 32], strides = [1, 1]} : vector<8x128xf32> to vector<8x32xf32>
    %139 = math.tanh %138 : vector<8x32xf32>
    %140 = arith.mulf %125, %109 : vector<8x32xf32>
    %141 = arith.mulf %131, %139 : vector<8x32xf32>
    %142 = arith.addf %140, %141 : vector<8x32xf32>
    %143 = math.tanh %142 : vector<8x32xf32>
    %144 = arith.mulf %137, %143 : vector<8x32xf32>
    %c3_50 = arith.constant 3 : index
    %c0_51 = arith.constant 0 : index
    %c0_52 = arith.constant 0 : index
    %145 = vector.load %arg8[%c3_50, %c0_51, %c0_52] : memref<8x8x32xf32, #tpu.memory_space<vmem>>, vector<1x8x32xf32>
    %146 = vector.shape_cast %145 : vector<1x8x32xf32> to vector<8x32xf32>
    %147 = vector.shape_cast %144 : vector<8x32xf32> to vector<1x8x32xf32>
    tpu.vector_store %arg8[%c3_50, %c0_51, %c0_52], %147 {strides = array<i32>} : memref<8x8x32xf32, #tpu.memory_space<vmem>>, vector<1x8x32xf32>,
    %c4 = arith.constant 4 : index
    %c0_53 = arith.constant 0 : index
    %c0_54 = arith.constant 0 : index
    %148 = vector.load %arg11[%c4, %c0_53, %c0_54] : memref<8x8x128xf32, #tpu.memory_space<vmem>>, vector<1x8x128xf32>
    %149 = vector.shape_cast %148 : vector<1x8x128xf32> to vector<8x128xf32>
    %150 = arith.truncf %144 : vector<8x32xf32> to vector<8x32xbf16>
    %cst_55 = arith.constant dense<0.000000e+00> : vector<8x128xf32>
    %151 = tpu.matmul %150, %13, %cst_55 {dimension_numbers = #tpu.dot_dimension_numbers<[1], [0], [0], [1], [0, 0, 1, 1], [], []>} : vector<8x32xbf16>, vector<32x128xbf16>, vector<8x128xf32> -> vector<8x128xf32>
    %152 = arith.addf %149, %151 : vector<8x128xf32>
    %153 = vector.extract_strided_slice %152 {offsets = [0, 0], sizes = [8, 32], strides = [1, 1]} : vector<8x128xf32> to vector<8x32xf32>
    %154 = arith.negf %153 : vector<8x32xf32>
    %155 = math.exp %154 : vector<8x32xf32>
    %cst_56 = arith.constant 1.000000e+00 : f32
    %156 = vector.broadcast %cst_56 : f32 to vector<8x32xf32>
    %157 = arith.addf %156, %155 : vector<8x32xf32>
    %158 = arith.divf %156, %157 : vector<8x32xf32>
    %159 = vector.extract_strided_slice %152 {offsets = [0, 32], sizes = [8, 32], strides = [1, 1]} : vector<8x128xf32> to vector<8x32xf32>
    %160 = arith.negf %159 : vector<8x32xf32>
    %161 = math.exp %160 : vector<8x32xf32>
    %cst_57 = arith.constant 1.000000e+00 : f32
    %162 = vector.broadcast %cst_57 : f32 to vector<8x32xf32>
    %163 = arith.addf %162, %161 : vector<8x32xf32>
    %164 = arith.divf %162, %163 : vector<8x32xf32>
    %165 = vector.extract_strided_slice %152 {offsets = [0, 64], sizes = [8, 32], strides = [1, 1]} : vector<8x128xf32> to vector<8x32xf32>
    %166 = arith.negf %165 : vector<8x32xf32>
    %167 = math.exp %166 : vector<8x32xf32>
    %cst_58 = arith.constant 1.000000e+00 : f32
    %168 = vector.broadcast %cst_58 : f32 to vector<8x32xf32>
    %169 = arith.addf %168, %167 : vector<8x32xf32>
    %170 = arith.divf %168, %169 : vector<8x32xf32>
    %171 = vector.extract_strided_slice %152 {offsets = [0, 96], sizes = [8, 32], strides = [1, 1]} : vector<8x128xf32> to vector<8x32xf32>
    %172 = math.tanh %171 : vector<8x32xf32>
    %173 = arith.mulf %158, %142 : vector<8x32xf32>
    %174 = arith.mulf %164, %172 : vector<8x32xf32>
    %175 = arith.addf %173, %174 : vector<8x32xf32>
    %176 = math.tanh %175 : vector<8x32xf32>
    %177 = arith.mulf %170, %176 : vector<8x32xf32>
    %c4_59 = arith.constant 4 : index
    %c0_60 = arith.constant 0 : index
    %c0_61 = arith.constant 0 : index
    %178 = vector.load %arg8[%c4_59, %c0_60, %c0_61] : memref<8x8x32xf32, #tpu.memory_space<vmem>>, vector<1x8x32xf32>
    %179 = vector.shape_cast %178 : vector<1x8x32xf32> to vector<8x32xf32>
    %180 = vector.shape_cast %177 : vector<8x32xf32> to vector<1x8x32xf32>
    tpu.vector_store %arg8[%c4_59, %c0_60, %c0_61], %180 {strides = array<i32>} : memref<8x8x32xf32, #tpu.memory_space<vmem>>, vector<1x8x32xf32>,
    %c5 = arith.constant 5 : index
    %c0_62 = arith.constant 0 : index
    %c0_63 = arith.constant 0 : index
    %181 = vector.load %arg11[%c5, %c0_62, %c0_63] : memref<8x8x128xf32, #tpu.memory_space<vmem>>, vector<1x8x128xf32>
    %182 = vector.shape_cast %181 : vector<1x8x128xf32> to vector<8x128xf32>
    %183 = arith.truncf %177 : vector<8x32xf32> to vector<8x32xbf16>
    %cst_64 = arith.constant dense<0.000000e+00> : vector<8x128xf32>
    %184 = tpu.matmul %183, %13, %cst_64 {dimension_numbers = #tpu.dot_dimension_numbers<[1], [0], [0], [1], [0, 0, 1, 1], [], []>} : vector<8x32xbf16>, vector<32x128xbf16>, vector<8x128xf32> -> vector<8x128xf32>
    %185 = arith.addf %182, %184 : vector<8x128xf32>
    %186 = vector.extract_strided_slice %185 {offsets = [0, 0], sizes = [8, 32], strides = [1, 1]} : vector<8x128xf32> to vector<8x32xf32>
    %187 = arith.negf %186 : vector<8x32xf32>
    %188 = math.exp %187 : vector<8x32xf32>
    %cst_65 = arith.constant 1.000000e+00 : f32
    %189 = vector.broadcast %cst_65 : f32 to vector<8x32xf32>
    %190 = arith.addf %189, %188 : vector<8x32xf32>
    %191 = arith.divf %189, %190 : vector<8x32xf32>
    %192 = vector.extract_strided_slice %185 {offsets = [0, 32], sizes = [8, 32], strides = [1, 1]} : vector<8x128xf32> to vector<8x32xf32>
    %193 = arith.negf %192 : vector<8x32xf32>
    %194 = math.exp %193 : vector<8x32xf32>
    %cst_66 = arith.constant 1.000000e+00 : f32
    %195 = vector.broadcast %cst_66 : f32 to vector<8x32xf32>
    %196 = arith.addf %195, %194 : vector<8x32xf32>
    %197 = arith.divf %195, %196 : vector<8x32xf32>
    %198 = vector.extract_strided_slice %185 {offsets = [0, 64], sizes = [8, 32], strides = [1, 1]} : vector<8x128xf32> to vector<8x32xf32>
    %199 = arith.negf %198 : vector<8x32xf32>
    %200 = math.exp %199 : vector<8x32xf32>
    %cst_67 = arith.constant 1.000000e+00 : f32
    %201 = vector.broadcast %cst_67 : f32 to vector<8x32xf32>
    %202 = arith.addf %201, %200 : vector<8x32xf32>
    %203 = arith.divf %201, %202 : vector<8x32xf32>
    %204 = vector.extract_strided_slice %185 {offsets = [0, 96], sizes = [8, 32], strides = [1, 1]} : vector<8x128xf32> to vector<8x32xf32>
    %205 = math.tanh %204 : vector<8x32xf32>
    %206 = arith.mulf %191, %175 : vector<8x32xf32>
    %207 = arith.mulf %197, %205 : vector<8x32xf32>
    %208 = arith.addf %206, %207 : vector<8x32xf32>
    %209 = math.tanh %208 : vector<8x32xf32>
    %210 = arith.mulf %203, %209 : vector<8x32xf32>
    %c5_68 = arith.constant 5 : index
    %c0_69 = arith.constant 0 : index
    %c0_70 = arith.constant 0 : index
    %211 = vector.load %arg8[%c5_68, %c0_69, %c0_70] : memref<8x8x32xf32, #tpu.memory_space<vmem>>, vector<1x8x32xf32>
    %212 = vector.shape_cast %211 : vector<1x8x32xf32> to vector<8x32xf32>
    %213 = vector.shape_cast %210 : vector<8x32xf32> to vector<1x8x32xf32>
    tpu.vector_store %arg8[%c5_68, %c0_69, %c0_70], %213 {strides = array<i32>} : memref<8x8x32xf32, #tpu.memory_space<vmem>>, vector<1x8x32xf32>,
    %c6 = arith.constant 6 : index
    %c0_71 = arith.constant 0 : index
    %c0_72 = arith.constant 0 : index
    %214 = vector.load %arg11[%c6, %c0_71, %c0_72] : memref<8x8x128xf32, #tpu.memory_space<vmem>>, vector<1x8x128xf32>
    %215 = vector.shape_cast %214 : vector<1x8x128xf32> to vector<8x128xf32>
    %216 = arith.truncf %210 : vector<8x32xf32> to vector<8x32xbf16>
    %cst_73 = arith.constant dense<0.000000e+00> : vector<8x128xf32>
    %217 = tpu.matmul %216, %13, %cst_73 {dimension_numbers = #tpu.dot_dimension_numbers<[1], [0], [0], [1], [0, 0, 1, 1], [], []>} : vector<8x32xbf16>, vector<32x128xbf16>, vector<8x128xf32> -> vector<8x128xf32>
    %218 = arith.addf %215, %217 : vector<8x128xf32>
    %219 = vector.extract_strided_slice %218 {offsets = [0, 0], sizes = [8, 32], strides = [1, 1]} : vector<8x128xf32> to vector<8x32xf32>
    %220 = arith.negf %219 : vector<8x32xf32>
    %221 = math.exp %220 : vector<8x32xf32>
    %cst_74 = arith.constant 1.000000e+00 : f32
    %222 = vector.broadcast %cst_74 : f32 to vector<8x32xf32>
    %223 = arith.addf %222, %221 : vector<8x32xf32>
    %224 = arith.divf %222, %223 : vector<8x32xf32>
    %225 = vector.extract_strided_slice %218 {offsets = [0, 32], sizes = [8, 32], strides = [1, 1]} : vector<8x128xf32> to vector<8x32xf32>
    %226 = arith.negf %225 : vector<8x32xf32>
    %227 = math.exp %226 : vector<8x32xf32>
    %cst_75 = arith.constant 1.000000e+00 : f32
    %228 = vector.broadcast %cst_75 : f32 to vector<8x32xf32>
    %229 = arith.addf %228, %227 : vector<8x32xf32>
    %230 = arith.divf %228, %229 : vector<8x32xf32>
    %231 = vector.extract_strided_slice %218 {offsets = [0, 64], sizes = [8, 32], strides = [1, 1]} : vector<8x128xf32> to vector<8x32xf32>
    %232 = arith.negf %231 : vector<8x32xf32>
    %233 = math.exp %232 : vector<8x32xf32>
    %cst_76 = arith.constant 1.000000e+00 : f32
    %234 = vector.broadcast %cst_76 : f32 to vector<8x32xf32>
    %235 = arith.addf %234, %233 : vector<8x32xf32>
    %236 = arith.divf %234, %235 : vector<8x32xf32>
    %237 = vector.extract_strided_slice %218 {offsets = [0, 96], sizes = [8, 32], strides = [1, 1]} : vector<8x128xf32> to vector<8x32xf32>
    %238 = math.tanh %237 : vector<8x32xf32>
    %239 = arith.mulf %224, %208 : vector<8x32xf32>
    %240 = arith.mulf %230, %238 : vector<8x32xf32>
    %241 = arith.addf %239, %240 : vector<8x32xf32>
    %242 = math.tanh %241 : vector<8x32xf32>
    %243 = arith.mulf %236, %242 : vector<8x32xf32>
    %c6_77 = arith.constant 6 : index
    %c0_78 = arith.constant 0 : index
    %c0_79 = arith.constant 0 : index
    %244 = vector.load %arg8[%c6_77, %c0_78, %c0_79] : memref<8x8x32xf32, #tpu.memory_space<vmem>>, vector<1x8x32xf32>
    %245 = vector.shape_cast %244 : vector<1x8x32xf32> to vector<8x32xf32>
    %246 = vector.shape_cast %243 : vector<8x32xf32> to vector<1x8x32xf32>
    tpu.vector_store %arg8[%c6_77, %c0_78, %c0_79], %246 {strides = array<i32>} : memref<8x8x32xf32, #tpu.memory_space<vmem>>, vector<1x8x32xf32>,
    %c7 = arith.constant 7 : index
    %c0_80 = arith.constant 0 : index
    %c0_81 = arith.constant 0 : index
    %247 = vector.load %arg11[%c7, %c0_80, %c0_81] : memref<8x8x128xf32, #tpu.memory_space<vmem>>, vector<1x8x128xf32>
    %248 = vector.shape_cast %247 : vector<1x8x128xf32> to vector<8x128xf32>
    %249 = arith.truncf %243 : vector<8x32xf32> to vector<8x32xbf16>
    %cst_82 = arith.constant dense<0.000000e+00> : vector<8x128xf32>
    %250 = tpu.matmul %249, %13, %cst_82 {dimension_numbers = #tpu.dot_dimension_numbers<[1], [0], [0], [1], [0, 0, 1, 1], [], []>} : vector<8x32xbf16>, vector<32x128xbf16>, vector<8x128xf32> -> vector<8x128xf32>
    %251 = arith.addf %248, %250 : vector<8x128xf32>
    %252 = vector.extract_strided_slice %251 {offsets = [0, 0], sizes = [8, 32], strides = [1, 1]} : vector<8x128xf32> to vector<8x32xf32>
    %253 = arith.negf %252 : vector<8x32xf32>
    %254 = math.exp %253 : vector<8x32xf32>
    %cst_83 = arith.constant 1.000000e+00 : f32
    %255 = vector.broadcast %cst_83 : f32 to vector<8x32xf32>
    %256 = arith.addf %255, %254 : vector<8x32xf32>
    %257 = arith.divf %255, %256 : vector<8x32xf32>
    %258 = vector.extract_strided_slice %251 {offsets = [0, 32], sizes = [8, 32], strides = [1, 1]} : vector<8x128xf32> to vector<8x32xf32>
    %259 = arith.negf %258 : vector<8x32xf32>
    %260 = math.exp %259 : vector<8x32xf32>
    %cst_84 = arith.constant 1.000000e+00 : f32
    %261 = vector.broadcast %cst_84 : f32 to vector<8x32xf32>
    %262 = arith.addf %261, %260 : vector<8x32xf32>
    %263 = arith.divf %261, %262 : vector<8x32xf32>
    %264 = vector.extract_strided_slice %251 {offsets = [0, 64], sizes = [8, 32], strides = [1, 1]} : vector<8x128xf32> to vector<8x32xf32>
    %265 = arith.negf %264 : vector<8x32xf32>
    %266 = math.exp %265 : vector<8x32xf32>
    %cst_85 = arith.constant 1.000000e+00 : f32
    %267 = vector.broadcast %cst_85 : f32 to vector<8x32xf32>
    %268 = arith.addf %267, %266 : vector<8x32xf32>
    %269 = arith.divf %267, %268 : vector<8x32xf32>
    %270 = vector.extract_strided_slice %251 {offsets = [0, 96], sizes = [8, 32], strides = [1, 1]} : vector<8x128xf32> to vector<8x32xf32>
    %271 = math.tanh %270 : vector<8x32xf32>
    %272 = arith.mulf %257, %241 : vector<8x32xf32>
    %273 = arith.mulf %263, %271 : vector<8x32xf32>
    %274 = arith.addf %272, %273 : vector<8x32xf32>
    %275 = math.tanh %274 : vector<8x32xf32>
    %276 = arith.mulf %269, %275 : vector<8x32xf32>
    %c7_86 = arith.constant 7 : index
    %c0_87 = arith.constant 0 : index
    %c0_88 = arith.constant 0 : index
    %277 = vector.load %arg8[%c7_86, %c0_87, %c0_88] : memref<8x8x32xf32, #tpu.memory_space<vmem>>, vector<1x8x32xf32>
    %278 = vector.shape_cast %277 : vector<1x8x32xf32> to vector<8x32xf32>
    %279 = vector.shape_cast %276 : vector<8x32xf32> to vector<1x8x32xf32>
    tpu.vector_store %arg8[%c7_86, %c0_87, %c0_88], %279 {strides = array<i32>} : memref<8x8x32xf32, #tpu.memory_space<vmem>>, vector<1x8x32xf32>,
    %c0_89 = arith.constant 0 : index
    %c0_90 = arith.constant 0 : index
    %280 = vector.load %arg9[%c0_89, %c0_90] : memref<8x32xf32, #tpu.memory_space<vmem>>, vector<8x32xf32>
    tpu.vector_store %arg9[%c0_89, %c0_90], %276 {strides = array<i32>} : memref<8x32xf32, #tpu.memory_space<vmem>>, vector<8x32xf32>,
    %c0_91 = arith.constant 0 : index
    %c0_92 = arith.constant 0 : index
    %281 = vector.load %arg10[%c0_91, %c0_92] : memref<8x32xf32, #tpu.memory_space<vmem>>, vector<8x32xf32>
    tpu.vector_store %arg10[%c0_91, %c0_92], %274 {strides = array<i32>} : memref<8x32xf32, #tpu.memory_space<vmem>>, vector<8x32xf32>,
    return
  }
  func.func @transform_0(%arg0: i32, %arg1: i32) -> (i32, i32, i32) {
    %c0_i32 = arith.constant 0 : i32
    %c0_i32_0 = arith.constant 0 : i32
    return %arg1, %arg0, %c0_i32 : i32, i32, i32
  }
  func.func @transform_1(%arg0: i32, %arg1: i32) -> (i32, i32) {
    %c0_i32 = arith.constant 0 : i32
    %c0_i32_0 = arith.constant 0 : i32
    return %arg0, %c0_i32 : i32, i32
  }
  func.func @transform_2(%arg0: i32, %arg1: i32) -> (i32, i32) {
    %c0_i32 = arith.constant 0 : i32
    %c0_i32_0 = arith.constant 0 : i32
    return %arg0, %c0_i32 : i32, i32
  }
  func.func @transform_3(%arg0: i32, %arg1: i32) -> (i32, i32) {
    %c0_i32 = arith.constant 0 : i32
    %c0_i32_0 = arith.constant 0 : i32
    %c0_i32_1 = arith.constant 0 : i32
    return %c0_i32, %c0_i32_0 : i32, i32
  }
  func.func @transform_4(%arg0: i32, %arg1: i32) -> (i32, i32) {
    %c0_i32 = arith.constant 0 : i32
    %c0_i32_0 = arith.constant 0 : i32
    %c0_i32_1 = arith.constant 0 : i32
    return %c0_i32, %c0_i32_0 : i32, i32
  }
  func.func @transform_5(%arg0: i32, %arg1: i32) -> (i32, i32) {
    %c0_i32 = arith.constant 0 : i32
    %c0_i32_0 = arith.constant 0 : i32
    %c0_i32_1 = arith.constant 0 : i32
    return %c0_i32, %c0_i32_0 : i32, i32
  }
  func.func @transform_6(%arg0: i32, %arg1: i32) -> (i32, i32, i32) {
    %c0_i32 = arith.constant 0 : i32
    %c0_i32_0 = arith.constant 0 : i32
    return %arg1, %arg0, %c0_i32 : i32, i32, i32
  }
}

</mosaic_0001>

<bundles_post_ra>
// kernel: tpu_custom_call.1
= control target key start
LH: loop header
LB: loop body
LE: loop exit
PB: predicated region body
PF: predicated region fallthrough
CT: control target
= control target key end

     0   :  { %11 = vsyncpa [#allocation6], 0  ;;  %s1505_s0 = inlined_call_operand.hbm [shape: f32[8,8,16], index: 0, kind: input, shape index: {}]   ;;  %s1506_s1 = inlined_call_operand.hbm [shape: f32[8,32], index: 1, kind: input, shape index: {}]   ;;  %s1507_s2 = inlined_call_operand.hbm [shape: f32[8,32], index: 2, kind: input, shape index: {}]   ;;  %s1508_s3 = inlined_call_operand.hbm [shape: bf16[32,128], index: 3, kind: input, shape index: {}]   ;;  %s1509_s4 = inlined_call_operand.vmem [shape: bf16[16,128], index: 4, kind: input, shape index: {}]   ;;  %s1510_s5 = inlined_call_operand.vmem [shape: f32[1,128], index: 5, kind: input, shape index: {}]   ;;  %s1511_s6 = inlined_call_operand.hbm [shape: f32[8,8,32], index: 6, kind: output, shape index: {}]  }
   0x1   :  { %12 = vsyncpa [#allocation9], 0 }
   0x2   :  { %13 = vsyncpa [#allocation12], 0 }
   0x3   :  { %14 = vsyncpa [#allocation7], 0  ;;  %s1197_s21 = smov [#allocation8]   ;;  %s1198_s23 = smov [#allocation5]  }
   0x4   :  { %s33_s22 = sshll.u32 %s1197_s21, 4  ;;  %s20_s24 = sshll.u32 %s1198_s23, 4  ;;  %s34_s22 = int_to_ptr.vmem [resolvable:$true] %s33_s22  ;;  %s1244_s24 = int_to_ptr.vmem [resolvable:$true] %s20_s24 }
   0x5   :  { %s1079_s27 = scalar_lea.hbm %s1506_s1, 128 }
   0x6   :  { %p1080_p0 = scmp.ne.s32.totalorder %s1506_s1, %s1079_s27  ;;  %p1083_p1 = scmp.lt.u32.totalorder %s1079_s27, %s1506_s1 }
   0x8   :  { %p1085_p2 = pnand %p1083_p1, %p1080_p0 }
   0xa   :  { %1088 = shalt.err (!%p1085_p2)
}
   0xb   :  { %s1089_s8 = scalar_lea.vmem %s34_s22, 128  ;;  %p1094_p4 = scmp.lt.s32.totalorder %s34_s22, %s34_s22 }
   0xc   :  { %p1090_p3 = scmp.ne.s32.totalorder %s34_s22, %s1089_s8  ;;  %p1095_p5 = scmp.lt.s32.totalorder %s1089_s8, %s1089_s8 }
   0xe   :  { %p1096_p6 = por %p1095_p5, %p1094_p4 }
  0x10   :  { %p1097_p7 = pnand %p1096_p6, %p1090_p3 }
  0x12   :  { %1100 = shalt.err (!%p1097_p7)
}
  0x13   :  { %36 = dma.hbm_to_vmem [thread:$0]  %s1506_s1, 128, %s34_s22, [#allocation9]  }
  0x14   :  { %s1101_s13 = scalar_lea.hbm %s1505_s0, 1024 }
  0x15   :  { %p1102_p8 = scmp.ne.s32.totalorder %s1505_s0, %s1101_s13  ;;  %p1105_p9 = scmp.lt.u32.totalorder %s1101_s13, %s1505_s0 }
  0x17   :  { %p1107_p10 = pnand %p1105_p9, %p1102_p8 }
  0x19   :  { %1110 = shalt.err (!%p1107_p10)
}
  0x1a   :  { %s1111_s18 = scalar_lea.vmem %s1244_s24, 1024  ;;  %p1116_p12 = scmp.lt.s32.totalorder %s1244_s24, %s1244_s24 }
  0x1b   :  { %p1112_p11 = scmp.ne.s32.totalorder %s1244_s24, %s1111_s18  ;;  %p1117_p13 = scmp.lt.s32.totalorder %s1111_s18, %s1111_s18 }
  0x1d   :  { %p1118_p0 = por %p1117_p13, %p1116_p12 }
  0x1f   :  { %p1119_p1 = pnand %p1118_p0, %p1112_p11 }
  0x21   :  { %1122 = shalt.err (!%p1119_p1)
}
  0x22   :  { %s1199_s1 = smov 128   ;;  %s1200_s19 = smov 8  }
  0x23   :  { %26 = dma.hbm_to_vmem [thread:$0]  %s1505_s0, 1024, %s1244_s24, [#allocation6], %s1199_s1, %s1199_s1, %s1200_s19  }
  0x24   :  { %s1201_s22 = smov [#allocation10]   ;;  %s1202_s25 = smov [#allocation11]  }
  0x25   :  { %s43_s23 = sshll.u32 %s1201_s22, 4  ;;  %s52_s26 = sshll.u32 %s1202_s25, 4  ;;  %s44_s23 = int_to_ptr.vmem [resolvable:$true] %s43_s23  ;;  %s1278_s26 = int_to_ptr.vmem [resolvable:$true] %s52_s26 }
  0x26   :  { %s1123_s29 = scalar_lea.hbm %s1507_s2, 128 }
  0x27   :  { %p1124_p2 = scmp.ne.s32.totalorder %s1507_s2, %s1123_s29  ;;  %p1127_p3 = scmp.lt.u32.totalorder %s1123_s29, %s1507_s2 }
  0x29   :  { %p1129_p4 = pnand %p1127_p3, %p1124_p2 }
  0x2b   :  { %1132 = shalt.err (!%p1129_p4)
}
  0x2c   :  { %s1133_s0 = scalar_lea.vmem %s44_s23, 128  ;;  %p1138_p6 = scmp.lt.s32.totalorder %s44_s23, %s44_s23 }
  0x2d   :  { %p1134_p5 = scmp.ne.s32.totalorder %s44_s23, %s1133_s0  ;;  %p1139_p7 = scmp.lt.s32.totalorder %s1133_s0, %s1133_s0 }
  0x2f   :  { %p1140_p8 = por %p1139_p7, %p1138_p6 }
  0x31   :  { %p1141_p9 = pnand %p1140_p8, %p1134_p5 }
  0x33   :  { %1144 = shalt.err (!%p1141_p9)
}
  0x34   :  { %46 = dma.hbm_to_vmem [thread:$0]  %s1507_s2, 128, %s44_s23, [#allocation9]  }
  0x35   :  { %s1145_s13 = scalar_lea.hbm %s1508_s3, 256 }
  0x36   :  { %p1146_p10 = scmp.ne.s32.totalorder %s1508_s3, %s1145_s13  ;;  %p1149_p11 = scmp.lt.u32.totalorder %s1145_s13, %s1508_s3 }
  0x38   :  { %p1151_p12 = pnand %p1149_p11, %p1146_p10 }
  0x3a   :  { %1154 = shalt.err (!%p1151_p12)
}
  0x3b   :  { %s1155_s18 = scalar_lea.vmem %s1278_s26, 256  ;;  %p1160_p0 = scmp.lt.s32.totalorder %s1278_s26, %s1278_s26 }
  0x3c   :  { %p1156_p13 = scmp.ne.s32.totalorder %s1278_s26, %s1155_s18  ;;  %p1161_p1 = scmp.lt.s32.totalorder %s1155_s18, %s1155_s18 }
  0x3e   :  { %p1162_p2 = por %p1161_p1, %p1160_p0 }
  0x40   :  { %p1163_p3 = pnand %p1162_p2, %p1156_p13 }
  0x42   :  { %1166 = shalt.err (!%p1163_p3)
}
  0x43   :  { %s1203_s2 = smov 64   ;;  %s1204_s20 = smov 4  }
  0x44   :  { %58 = dma.hbm_to_vmem [thread:$0]  %s1508_s3, 256, %s1278_s26, [#allocation12], %s1203_s2, %s1203_s2, %s1204_s20  }
  0x45   :  { %1189 = dma.done.wait [#allocation6], 1024  }
  0x46   :  { %1190 = vsyncadd [#allocation6], 4294966272 }
  0x47   :  { %1191 = dma.done.wait [#allocation9], 256  }
  0x48   :  { %1192 = vsyncadd [#allocation9], 4294967040 }
  0x49   :  { %1193 = dma.done.wait [#allocation12], 256  }
  0x4a   :  { %1194 = vsyncadd [#allocation12], 4294967040  ;;  %v1205_v0 = vmov 0.0   ;;  %vm1206_vm0 = vmmov 0   ;;  %v1012_v1 = vld [vmem:[%s1509_s4] sm:$0xff]   ;;  %v85_v3 = vld [vmem:[#allocation5] sm:$0xff] }
  0x4b   :  { %936 = vmatprep.subr.bf16.mxu1 %v1205_v0  ;;  %940 = vmatprep.mubr.msk.bf16.mxu1 %vm1206_vm0, %v1205_v0  ;;  %v1317_v2 = vld [vmem:[#allocation11] sm:$0xff]   ;;  %v86_v4 = vld [vmem:[#allocation5 + $0x8] sm:$0xff]  ;;  %vm112_vm1 = vcmask 130048   ;;  %vm81_vm2 = vcmask 261120   ;;  %v88_v7 = vld [vmem:[#allocation5 + $0x18] sm:$0xff]  ;;  %s1208_s26 = smov [#allocation13]  }
  0x4c   :  { %926 = vmatprep.subr.bf16.mxu0 %v1012_v1  ;;  %v87_v5 = vld [vmem:[#allocation5 + $0x10] sm:$0xff]  ;;  %937 = vmatpush3.bf16.msra.mxu1 %v1317_v2  ;;  %v93_v6 = vpack.c.bf16 %v86_v4, %v85_v3  ;;  %v1321_v9 = vld [vmem:[#allocation11 + $0x8] sm:$0xff]   ;;  %v80_v10 = vld [vmem:[#allocation8] sm:$0xff]  ;;  %s859_s27 = sshll.u32 %s1208_s26, 4  ;;  %s860_s27 = int_to_ptr.vmem [resolvable:$true] %s859_s27 }
  0x4d   :  { %927 = vmatpush3.bf16.msra.mxu0 %v1012_v1  ;;  %v94_v8 = vpack.c.bf16 %v88_v7, %v87_v5  ;;  %938 = vmatprep.subr.bf16.mxu1 %v1205_v0  ;;  %82 = vst.msk [vmem:[#allocation2] sm:$0xff] %vm81_vm2, %v80_v10  ;;  %v83_v13 = vld [vmem:[#allocation10] sm:$0xff]  ;;  %v1348_v17 = vld [vmem:[%s1510_s5] ss:$0 sm:$0xff]  ;;  %s1207_s5 = smov 96   ;;  %v89_v57 = vld [vmem:[#allocation5 + $0x20] sm:$0xff]  ;;  %p1172_p5 = scmp.lt.s32.totalorder %s860_s27, %s860_s27 }
  0x4e   :  { %952 = vmatprep.subr.bf16.mxu0 %v1205_v0  ;;  %928 = vmatprep.mubr.msk.bf16.mxu0 %vm112_vm1, %v93_v6  ;;  %84 = vst.msk [vmem:[#allocation3] sm:$0xff] %vm81_vm2, %v83_v13  ;;  %v90_v58 = vld [vmem:[#allocation5 + $0x28] sm:$0xff]  ;;  %v91_v59 = vld [vmem:[#allocation5 + $0x30] sm:$0xff]  ;;  %v92_v61 = vld [vmem:[#allocation5 + $0x38] sm:$0xff]  ;;  %s1167_s28 = scalar_lea.vmem %s860_s27, 1024 }
  0x4f   :  { %v95_v60 = vpack.c.bf16 %v90_v58, %v89_v57  ;;  %v96_v62 = vpack.c.bf16 %v92_v61, %v91_v59  ;;  %p1168_p4 = scmp.ne.s32.totalorder %s860_s27, %s1167_s28  ;;  %p1173_p6 = scmp.lt.s32.totalorder %s1167_s28, %s1167_s28 }
  0x50   :  { %929 = vmatmul.mubr.msk.bf16.vlgmr.msra.gmra.mrb[0].mxu0 %vm112_vm1, %v94_v8  ;;  %939 = vmatpush3.bf16.msra.mxu1 %v1321_v9 }
  0x51   :  { %953 = vmatpush3.bf16.msra.mxu0 %v1317_v2  ;;  %944 = vmatprep.subr.bf16.mxu1 %v1205_v0  ;;  %p1174_p7 = por %p1173_p6, %p1172_p5 }
  0x52   :  { %954 = vmatprep.subr.bf16.mxu0 %v1205_v0  ;;  %932 = vmatprep.mubr.msk.bf16.mxu0 %vm112_vm1, %v95_v60 }
  0x53   :  { %p1175_p8 = pnand %p1174_p7, %p1168_p4 }
  0x54   :  { %v202_v11 = vld [vmem:[#allocation2] sm:$0xff] }
  0x55   :  { %955 = vmatpush3.bf16.msra.mxu0 %v1321_v9  ;;  %v205_v12 = vpack.c.bf16 %v202_v11, %v202_v11  ;;  %v203_v32 = vld [vmem:[#allocation3] sm:$0xff] }
  0x56   :  { %968 = vmatprep.subr.bf16.mxu0 %v1205_v0 }
  0x57   :  { %941 = vmatmul.mubr.msk.bf16.vlgmr.msra.gmra.mrb[0].mxu1 %vm81_vm2, %v205_v12 }
  0x58   :  { %945 = vmatpush3.bf16.msra.mxu1 %v1317_v2  ;;  %948 = vmatprep.mubr.msk.bf16.mxu1 %vm1206_vm0, %v1205_v0 }
  0x59   :  { %946 = vmatprep.subr.bf16.mxu1 %v1205_v0  ;;  %933 = vmatmul.mubr.msk.bf16.gmra.mrb[4].mxu0 %vm112_vm1, %v96_v62 }
  0x5a   :  { %956 = vmatprep.mubr.msk.bf16.mxu0 %vm1206_vm0, %v1205_v0 }
  0x5c   :  { %947 = vmatpush3.bf16.msra.mxu1 %v1321_v9 }
  0x5d   :  { %960 = vmatprep.subr.bf16.mxu1 %v1205_v0 }
 0x123   :  { %v1341_v14 = vpop.f32.mrb[0].mxu0 }
 0x124   :  { %v159_v15 = vpop.f32.mrb[1].mxu0  ;;  %v168_v11 = vadd.f32 %v1341_v14, %v1348_v17 }
 0x125   :  { %v1343_v16 = vpop.f32.mrb[2].mxu0  ;;  %v160_v19 = vadd.f32 %v1348_v17, %v159_v15 }
 0x126   :  { %v162_v18 = vpop.f32.mrb[3].mxu0 }
 0x127   :  { %v163_v41 = vadd.f32 %v1348_v17, %v162_v18 }
 0x12a   :  { %v256_v20 = vpop.f32.mrb[0].mxu1 }
 0x12b   :  { %v262_v21 = vadd.f32 %v256_v20, %v160_v19  ;;  %v942_v22 = vpop.f32.mrb[1].mxu1 }
 0x12c   :  { %v259_v23 = vpop.f32.mrb[2].mxu1  ;;  %v1379_v5 = vpop.f32.mrb[4].mxu0 }
 0x12d   :  { %v943_v24 = vpop.f32.mrb[3].mxu1  ;;  %1015 = vtanh.f32 %v262_v21  ;;  %v882_v26 = vmul.f32 -1.442695, %v262_v21  ;;  %v1381_v6 = vpop.f32.mrb[5].mxu0 }
 0x12e   :  { %v1383_v7 = vpop.f32.mrb[6].mxu0 }
 0x12f   :  { %1017 = vpow2.f32 %v882_v26  ;;  %v1385_v8 = vpop.f32.mrb[7].mxu0 }
 0x137   :  { %v1016_v25 = vpop.eup %1015 }
 0x138   :  { %272 = vrot.lane.b32.xlu0 %v1016_v25, %s1203_s2 }
 0x139   :  { %v1018_v27 = vpop.eup %1017 }
 0x13a   :  { %v266_v28 = vadd.f32 1.0, %v1018_v27 }
 0x13c   :  { %1019 = vrcp.f32 %v266_v28 }
 0x146   :  { %v1020_v29 = vpop.eup %1019 }
 0x147   :  { %v270_v33 = vmul.f32 %v1020_v29, %v203_v32 }
 0x1aa   :  { %v273_v30 = vpop.permute.xlu0 %272 }
 0x1ab   :  { %v275_v31 = vmul.f32 %v1020_v29, %v273_v30 }
 0x1ad   :  { %277 = vrot.lane.b32.xlu0 %v275_v31, %s1207_s5 }
 0x21f   :  { %v278_v34 = vpop.permute.xlu0 %277 }
 0x220   :  { %v280_v35 = vadd.f32 %v278_v34, %v270_v33  ;;  %v171_v34 = vadd.f32 %v1343_v16, %v1348_v17 }
 0x222   :  { %1021 = vtanh.f32 %v280_v35 }
 0x22c   :  { %v1022_v36 = vpop.eup %1021 }
 0x22d   :  { %283 = vrot.lane.b32.xlu1 %v1022_v36, %s1203_s2 }
 0x29f   :  { %v284_v37 = vpop.permute.xlu1 %283 }
 0x2a0   :  { %v1354_v38 = vmul.f32 %v1020_v29, %v284_v37 }
 0x2a2   :  { %v294_v39 = vpack.c.bf16 %v1354_v38, %v1354_v38 }
 0x2a4   :  { %296 = vrot.lane.b32.xlu1 %v294_v39, %s1203_s2 }
 0x316   :  { %v297_v40 = vpop.permute.xlu1 %296 }
 0x317   :  { %949 = vmatmul.mubr.msk.bf16.vlgmr.msra.gmra.mrb[4].mxu1 %vm81_vm2, %v297_v40 }
 0x318   :  { %961 = vmatpush3.bf16.msra.mxu1 %v1317_v2  ;;  %964 = vmatprep.mubr.msk.bf16.mxu1 %vm1206_vm0, %v1205_v0 }
 0x319   :  { %962 = vmatprep.subr.bf16.mxu1 %v1205_v0 }
 0x31c   :  { %963 = vmatpush3.bf16.msra.mxu1 %v1321_v9 }
 0x31d   :  { %976 = vmatprep.subr.bf16.mxu1 %v1205_v0 }
 0x3ea   :  { %v335_v42 = vpop.f32.mrb[4].mxu1 }
 0x3eb   :  { %v341_v43 = vadd.f32 %v335_v42, %v163_v41  ;;  %v950_v44 = vpop.f32.mrb[5].mxu1 }
 0x3ec   :  { %v338_v45 = vpop.f32.mrb[6].mxu1 }
 0x3ed   :  { %1023 = vtanh.f32 %v341_v43  ;;  %v951_v46 = vpop.f32.mrb[7].mxu1  ;;  %v884_v48 = vmul.f32 -1.442695, %v341_v43 }
 0x3ef   :  { %1025 = vpow2.f32 %v884_v48 }
 0x3f7   :  { %v1024_v47 = vpop.eup %1023 }
 0x3f8   :  { %351 = vrot.lane.b32.xlu0 %v1024_v47, %s1203_s2 }
 0x3f9   :  { %v1026_v49 = vpop.eup %1025 }
 0x3fa   :  { %v345_v50 = vadd.f32 1.0, %v1026_v49 }
 0x3fc   :  { %1027 = vrcp.f32 %v345_v50 }
 0x406   :  { %v1028_v51 = vpop.eup %1027 }
 0x407   :  { %v349_v54 = vmul.f32 %v1028_v51, %v280_v35 }
 0x46a   :  { %v352_v52 = vpop.permute.xlu0 %351 }
 0x46b   :  { %v354_v53 = vmul.f32 %v1028_v51, %v352_v52 }
 0x46d   :  { %356 = vrot.lane.b32.xlu1 %v354_v53, %s1207_s5 }
 0x4df   :  { %v357_v55 = vpop.permute.xlu1 %356 }
 0x4e0   :  { %v359_v56 = vadd.f32 %v357_v55, %v349_v54  ;;  %v176_v55 = vadd.f32 %v1348_v17, %v1381_v6 }
 0x4e2   :  { %1029 = vtanh.f32 %v359_v56 }
 0x4ec   :  { %v1030_v63 = vpop.eup %1029 }
 0x4ed   :  { %362 = vrot.lane.b32.xlu0 %v1030_v63, %s1203_s2 }
 0x55f   :  { %v363_v1 = vpop.permute.xlu0 %362 }
 0x560   :  { %v1374_v3 = vmul.f32 %v1028_v51, %v363_v1 }
 0x562   :  { %v374_v4 = vpack.c.bf16 %v1374_v3, %v1374_v3 }
 0x564   :  { %376 = vrot.lane.b32.xlu1 %v374_v4, %s1203_s2 }
 0x5d6   :  { %v377_v10 = vpop.permute.xlu1 %376 }
 0x5d7   :  { %957 = vmatmul.mubr.msk.bf16.vlgmr.msra.gmra.mrb[8].mxu0 %vm81_vm2, %v377_v10 }
 0x5d8   :  { %969 = vmatpush3.bf16.msra.mxu0 %v1317_v2  ;;  %972 = vmatprep.mubr.msk.bf16.mxu0 %vm1206_vm0, %v1205_v0 }
 0x5d9   :  { %970 = vmatprep.subr.bf16.mxu0 %v1205_v0 }
 0x5dc   :  { %971 = vmatpush3.bf16.msra.mxu0 %v1321_v9 }
 0x5dd   :  { %984 = vmatprep.subr.bf16.mxu0 %v1205_v0 }
 0x6aa   :  { %v415_v12 = vpop.f32.mrb[8].mxu0 }
 0x6ab   :  { %v421_v13 = vadd.f32 %v415_v12, %v168_v11  ;;  %v958_v15 = vpop.f32.mrb[9].mxu0 }
 0x6ac   :  { %v418_v18 = vpop.f32.mrb[10].mxu0 }
 0x6ad   :  { %1031 = vtanh.f32 %v421_v13  ;;  %v959_v19 = vpop.f32.mrb[11].mxu0  ;;  %v886_v21 = vmul.f32 -1.442695, %v421_v13 }
 0x6af   :  { %1033 = vpow2.f32 %v886_v21 }
 0x6b7   :  { %v1032_v20 = vpop.eup %1031 }
 0x6b8   :  { %431 = vrot.lane.b32.xlu0 %v1032_v20, %s1203_s2 }
 0x6b9   :  { %v1034_v22 = vpop.eup %1033 }
 0x6ba   :  { %v425_v23 = vadd.f32 1.0, %v1034_v22  ;;  %v179_v22 = vadd.f32 %v1348_v17, %v1385_v8 }
 0x6bc   :  { %1035 = vrcp.f32 %v425_v23 }
 0x6c6   :  { %v1036_v24 = vpop.eup %1035 }
 0x6c7   :  { %v429_v14 = vmul.f32 %v1036_v24, %v359_v56 }
 0x72a   :  { %v432_v25 = vpop.permute.xlu0 %431 }
 0x72b   :  { %v434_v26 = vmul.f32 %v1036_v24, %v432_v25 }
 0x72d   :  { %436 = vrot.lane.b32.xlu1 %v434_v26, %s1207_s5 }
 0x79f   :  { %v437_v27 = vpop.permute.xlu1 %436 }
 0x7a0   :  { %v439_v28 = vadd.f32 %v437_v27, %v429_v14 }
 0x7a2   :  { %1037 = vtanh.f32 %v439_v28 }
 0x7ac   :  { %v1038_v29 = vpop.eup %1037 }
 0x7ad   :  { %442 = vrot.lane.b32.xlu0 %v1038_v29, %s1203_s2 }
 0x81f   :  { %v443_v30 = vpop.permute.xlu0 %442 }
 0x820   :  { %v1399_v31 = vmul.f32 %v1036_v24, %v443_v30 }
 0x822   :  { %v454_v32 = vpack.c.bf16 %v1399_v31, %v1399_v31 }
 0x824   :  { %456 = vrot.lane.b32.xlu1 %v454_v32, %s1203_s2 }
 0x896   :  { %v457_v33 = vpop.permute.xlu1 %456 }
 0x897   :  { %965 = vmatmul.mubr.msk.bf16.vlgmr.msra.gmra.mrb[8].mxu1 %vm81_vm2, %v457_v33 }
 0x898   :  { %977 = vmatpush3.bf16.msra.mxu1 %v1317_v2  ;;  %980 = vmatprep.mubr.msk.bf16.mxu1 %vm1206_vm0, %v1205_v0 }
 0x899   :  { %978 = vmatprep.subr.bf16.mxu1 %v1205_v0 }
 0x89c   :  { %979 = vmatpush3.bf16.msra.mxu1 %v1321_v9 }
 0x89d   :  { %992 = vmatprep.subr.bf16.mxu1 %v1205_v0 }
 0x96a   :  { %v495_v35 = vpop.f32.mrb[8].mxu1 }
 0x96b   :  { %v501_v36 = vadd.f32 %v495_v35, %v171_v34  ;;  %v966_v37 = vpop.f32.mrb[9].mxu1 }
 0x96c   :  { %v498_v39 = vpop.f32.mrb[10].mxu1 }
 0x96d   :  { %1039 = vtanh.f32 %v501_v36  ;;  %v967_v40 = vpop.f32.mrb[11].mxu1  ;;  %v888_v42 = vmul.f32 -1.442695, %v501_v36 }
 0x96e   :  { %v184_v40 = vadd.f32 %v1379_v5, %v1348_v17 }
 0x96f   :  { %1041 = vpow2.f32 %v888_v42 }
 0x977   :  { %v1040_v41 = vpop.eup %1039 }
 0x978   :  { %511 = vrot.lane.b32.xlu0 %v1040_v41, %s1203_s2 }
 0x979   :  { %v1042_v43 = vpop.eup %1041 }
 0x97a   :  { %v505_v44 = vadd.f32 1.0, %v1042_v43 }
 0x97c   :  { %1043 = vrcp.f32 %v505_v44 }
 0x986   :  { %v1044_v45 = vpop.eup %1043 }
 0x987   :  { %v509_v16 = vmul.f32 %v1044_v45, %v439_v28 }
 0x9ea   :  { %v512_v46 = vpop.permute.xlu0 %511 }
 0x9eb   :  { %v514_v47 = vmul.f32 %v1044_v45, %v512_v46 }
 0x9ed   :  { %516 = vrot.lane.b32.xlu1 %v514_v47, %s1207_s5 }
 0xa5f   :  { %v517_v48 = vpop.permute.xlu1 %516 }
 0xa60   :  { %v519_v49 = vadd.f32 %v517_v48, %v509_v16 }
 0xa62   :  { %1045 = vtanh.f32 %v519_v49 }
 0xa6c   :  { %v1046_v50 = vpop.eup %1045 }
 0xa6d   :  { %522 = vrot.lane.b32.xlu0 %v1046_v50, %s1203_s2 }
 0xadf   :  { %v523_v51 = vpop.permute.xlu0 %522 }
 0xae0   :  { %v1416_v52 = vmul.f32 %v1044_v45, %v523_v51 }
 0xae2   :  { %v534_v53 = vpack.c.bf16 %v1416_v52, %v1416_v52 }
 0xae4   :  { %536 = vrot.lane.b32.xlu1 %v534_v53, %s1203_s2 }
 0xb56   :  { %v537_v54 = vpop.permute.xlu1 %536 }
 0xb57   :  { %973 = vmatmul.mubr.msk.bf16.vlgmr.msra.gmra.mrb[12].mxu0 %vm81_vm2, %v537_v54 }
 0xb58   :  { %985 = vmatpush3.bf16.msra.mxu0 %v1317_v2  ;;  %988 = vmatprep.mubr.msk.bf16.mxu0 %vm1206_vm0, %v1205_v0 }
 0xb59   :  { %986 = vmatprep.subr.bf16.mxu0 %v1205_v0 }
 0xb5c   :  { %987 = vmatpush3.bf16.msra.mxu0 %v1321_v9 }
 0xc2a   :  { %v575_v56 = vpop.f32.mrb[12].mxu0 }
 0xc2b   :  { %v581_v57 = vadd.f32 %v575_v56, %v176_v55  ;;  %v974_v58 = vpop.f32.mrb[13].mxu0 }
 0xc2c   :  { %v578_v59 = vpop.f32.mrb[14].mxu0 }
 0xc2d   :  { %1047 = vtanh.f32 %v581_v57  ;;  %v975_v60 = vpop.f32.mrb[15].mxu0  ;;  %v890_v62 = vmul.f32 -1.442695, %v581_v57 }
 0xc2e   :  { %v187_v60 = vadd.f32 %v1383_v7, %v1348_v17 }
 0xc2f   :  { %1049 = vpow2.f32 %v890_v62 }
 0xc37   :  { %v1048_v61 = vpop.eup %1047 }
 0xc38   :  { %591 = vrot.lane.b32.xlu0 %v1048_v61, %s1203_s2 }
 0xc39   :  { %v1050_v63 = vpop.eup %1049 }
 0xc3a   :  { %v585_v1 = vadd.f32 1.0, %v1050_v63 }
 0xc3c   :  { %1051 = vrcp.f32 %v585_v1 }
 0xc46   :  { %v1052_v4 = vpop.eup %1051 }
 0xc47   :  { %v589_v6 = vmul.f32 %v1052_v4, %v519_v49 }
 0xcaa   :  { %v592_v10 = vpop.permute.xlu0 %591 }
 0xcab   :  { %v594_v11 = vmul.f32 %v1052_v4, %v592_v10 }
 0xcad   :  { %596 = vrot.lane.b32.xlu1 %v594_v11, %s1207_s5 }
 0xd1f   :  { %v597_v12 = vpop.permute.xlu1 %596 }
 0xd20   :  { %v599_v13 = vadd.f32 %v597_v12, %v589_v6 }
 0xd22   :  { %1053 = vtanh.f32 %v599_v13 }
 0xd2c   :  { %v1054_v15 = vpop.eup %1053 }
 0xd2d   :  { %602 = vrot.lane.b32.xlu0 %v1054_v15, %s1203_s2 }
 0xd9f   :  { %v603_v18 = vpop.permute.xlu0 %602 }
 0xda0   :  { %v1432_v19 = vmul.f32 %v1052_v4, %v603_v18 }
 0xda2   :  { %v614_v20 = vpack.c.bf16 %v1432_v19, %v1432_v19 }
 0xda4   :  { %616 = vrot.lane.b32.xlu1 %v614_v20, %s1203_s2 }
 0xe16   :  { %v617_v21 = vpop.permute.xlu1 %616 }
 0xe17   :  { %981 = vmatmul.mubr.msk.bf16.vlgmr.msra.gmra.mrb[12].mxu1 %vm81_vm2, %v617_v21 }
 0xe18   :  { %993 = vmatpush3.bf16.msra.mxu1 %v1317_v2  ;;  %996 = vmatprep.mubr.msk.bf16.mxu1 %vm1206_vm0, %v1205_v0 }
 0xe19   :  { %994 = vmatprep.subr.bf16.mxu1 %v1205_v0 }
 0xe1c   :  { %995 = vmatpush3.bf16.msra.mxu1 %v1321_v9 }
 0xeea   :  { %v655_v23 = vpop.f32.mrb[12].mxu1 }
 0xeeb   :  { %v661_v24 = vadd.f32 %v655_v23, %v179_v22  ;;  %v982_v25 = vpop.f32.mrb[13].mxu1 }
 0xeec   :  { %v658_v26 = vpop.f32.mrb[14].mxu1 }
 0xeed   :  { %1055 = vtanh.f32 %v661_v24  ;;  %v983_v14 = vpop.f32.mrb[15].mxu1  ;;  %v892_v2 = vmul.f32 -1.442695, %v661_v24 }
 0xeef   :  { %1057 = vpow2.f32 %v892_v2 }
 0xef7   :  { %v1056_v27 = vpop.eup %1055 }
 0xef8   :  { %671 = vrot.lane.b32.xlu0 %v1056_v27, %s1203_s2 }
 0xef9   :  { %v1058_v28 = vpop.eup %1057 }
 0xefa   :  { %v665_v29 = vadd.f32 1.0, %v1058_v28 }
 0xefc   :  { %1059 = vrcp.f32 %v665_v29 }
 0xf06   :  { %v1060_v0 = vpop.eup %1059 }
 0xf07   :  { %v669_v8 = vmul.f32 %v1060_v0, %v599_v13 }
 0xf6a   :  { %v672_v30 = vpop.permute.xlu0 %671 }
 0xf6b   :  { %v674_v9 = vmul.f32 %v1060_v0, %v672_v30 }
 0xf6d   :  { %676 = vrot.lane.b32.xlu1 %v674_v9, %s1207_s5 }
 0xfdf   :  { %v677_v32 = vpop.permute.xlu1 %676 }
 0xfe0   :  { %v679_v33 = vadd.f32 %v677_v32, %v669_v8 }
 0xfe2   :  { %1061 = vtanh.f32 %v679_v33 }
 0xfec   :  { %v1062_v34 = vpop.eup %1061 }
 0xfed   :  { %682 = vrot.lane.b32.xlu0 %v1062_v34, %s1203_s2 }
0x105f   :  { %v683_v35 = vpop.permute.xlu0 %682 }
0x1060   :  { %v1448_v36 = vmul.f32 %v1060_v0, %v683_v35 }
0x1062   :  { %v694_v37 = vpack.c.bf16 %v1448_v36, %v1448_v36 }
0x1064   :  { %696 = vrot.lane.b32.xlu1 %v694_v37, %s1203_s2 }
0x10d6   :  { %v697_v39 = vpop.permute.xlu1 %696 }
0x10d7   :  { %989 = vmatmul.mubr.msk.bf16.vlgmr.msra.gmra.mrb[16].mxu0 %vm81_vm2, %v697_v39 }
0x11aa   :  { %v735_v41 = vpop.f32.mrb[16].mxu0 }
0x11ab   :  { %v741_v42 = vadd.f32 %v735_v41, %v184_v40  ;;  %v990_v43 = vpop.f32.mrb[17].mxu0 }
0x11ac   :  { %v738_v44 = vpop.f32.mrb[18].mxu0 }
0x11ad   :  { %1063 = vtanh.f32 %v741_v42  ;;  %v991_v45 = vpop.f32.mrb[19].mxu0  ;;  %v894_v47 = vmul.f32 -1.442695, %v741_v42 }
0x11af   :  { %1065 = vpow2.f32 %v894_v47 }
0x11b7   :  { %v1064_v46 = vpop.eup %1063 }
0x11b8   :  { %751 = vrot.lane.b32.xlu0 %v1064_v46, %s1203_s2 }
0x11b9   :  { %v1066_v16 = vpop.eup %1065 }
0x11ba   :  { %v745_v48 = vadd.f32 1.0, %v1066_v16 }
0x11bc   :  { %1067 = vrcp.f32 %v745_v48 }
0x11c6   :  { %v1068_v49 = vpop.eup %1067 }
0x11c7   :  { %v749_v5 = vmul.f32 %v1068_v49, %v679_v33 }
0x122a   :  { %v752_v50 = vpop.permute.xlu0 %751 }
0x122b   :  { %v754_v51 = vmul.f32 %v1068_v49, %v752_v50 }
0x122d   :  { %756 = vrot.lane.b32.xlu1 %v754_v51, %s1207_s5 }
0x129f   :  { %v757_v53 = vpop.permute.xlu1 %756 }
0x12a0   :  { %v759_v54 = vadd.f32 %v757_v53, %v749_v5 }
0x12a2   :  { %1069 = vtanh.f32 %v759_v54 }
0x12ac   :  { %v1070_v55 = vpop.eup %1069 }
0x12ad   :  { %762 = vrot.lane.b32.xlu0 %v1070_v55, %s1203_s2 }
0x131f   :  { %v763_v56 = vpop.permute.xlu0 %762 }
0x1320   :  { %v765_v57 = vmul.f32 %v1068_v49, %v763_v56 }
0x1322   :  { %v774_v58 = vpack.c.bf16 %v765_v57, %v765_v57 }
0x1324   :  { %776 = vrot.lane.b32.xlu1 %v774_v58, %s1203_s2 }
0x1396   :  { %v777_v59 = vpop.permute.xlu1 %776 }
0x1397   :  { %997 = vmatmul.mubr.msk.bf16.vlgmr.msra.gmra.mrb[16].mxu1 %vm81_vm2, %v777_v59 }
0x146a   :  { %v815_v61 = vpop.f32.mrb[16].mxu1 }
0x146b   :  { %v821_v62 = vadd.f32 %v815_v61, %v187_v60  ;;  %v998_v63 = vpop.f32.mrb[17].mxu1 }
0x146c   :  { %v818_v1 = vpop.f32.mrb[18].mxu1 }
0x146d   :  { %1071 = vtanh.f32 %v821_v62  ;;  %v999_v4 = vpop.f32.mrb[19].mxu1  ;;  %v896_v11 = vmul.f32 -1.442695, %v821_v62 }
0x146f   :  { %1073 = vpow2.f32 %v896_v11 }
0x1477   :  { %v1072_v10 = vpop.eup %1071 }
0x1478   :  { %831 = vrot.lane.b32.xlu0 %v1072_v10, %s1203_s2 }
0x1479   :  { %v1074_v6 = vpop.eup %1073 }
0x147a   :  { %v825_v12 = vadd.f32 1.0, %v1074_v6 }
0x147c   :  { %1075 = vrcp.f32 %v825_v12 }
0x1486   :  { %v1076_v13 = vpop.eup %1075 }
0x1487   :  { %v829_v17 = vmul.f32 %v1076_v13, %v759_v54 }
0x14ea   :  { %v832_v15 = vpop.permute.xlu0 %831 }
0x14eb   :  { %v834_v18 = vmul.f32 %v1076_v13, %v832_v15 }
0x14ed   :  { %836 = vrot.lane.b32.xlu1 %v834_v18, %s1207_s5 }
0x14f1   :  { %288 = vrot.lane.b32.xlu1 %v1354_v38, %s1203_s2 }
0x14f5   :  { %447 = vrot.lane.b32.xlu1 %v1399_v31, %s1203_s2 }
0x14f9   :  { %607 = vrot.lane.b32.xlu1 %v1432_v19, %s1203_s2 }
0x14fd   :  { %767 = vrot.lane.b32.xlu1 %v765_v57, %s1203_s2 }
0x155f   :  { %v837_v7 = vpop.permute.xlu1 %836 }
0x1560   :  { %v839_v20 = vadd.f32 %v837_v7, %v829_v17 }
0x1562   :  { %1077 = vtanh.f32 %v839_v20  ;;  %853 = vst.msk [vmem:[#allocation3] sm:$0xff] %vm81_vm2, %v839_v20 }
0x1563   :  { %v289_v21 = vpop.permute.xlu1 %288 }
0x1564   :  { %291 = vst.msk [vmem:[#allocation13] sm:$0xff] %vm81_vm2, %v289_v21 }
0x1567   :  { %v448_v22 = vpop.permute.xlu1 %447 }
0x1568   :  { %451 = vst.msk [vmem:[#allocation13 + $0x10] sm:$0xff] %vm81_vm2, %v448_v22 }
0x156b   :  { %v608_v38 = vpop.permute.xlu1 %607 }
0x156c   :  { %v1078_v23 = vpop.eup %1077  ;;  %611 = vst.msk [vmem:[#allocation13 + $0x20] sm:$0xff] %vm81_vm2, %v608_v38 }
0x156d   :  { %842 = vrot.lane.b32.xlu0 %v1078_v23, %s1203_s2 }
0x156f   :  { %v768_v31 = vpop.permute.xlu1 %767 }
0x1570   :  { %771 = vst.msk [vmem:[#allocation13 + $0x30] sm:$0xff] %vm81_vm2, %v768_v31 }
0x1571   :  { %367 = vrot.lane.b32.xlu0 %v1374_v3, %s1203_s2 }
0x1575   :  { %527 = vrot.lane.b32.xlu0 %v1416_v52, %s1203_s2 }
0x1579   :  { %687 = vrot.lane.b32.xlu0 %v1448_v36, %s1203_s2 }
0x15df   :  { %v843_v19 = vpop.permute.xlu0 %842 }
0x15e0   :  { %v845_v24 = vmul.f32 %v1076_v13, %v843_v19 }
0x15e2   :  { %847 = vrot.lane.b32.xlu0 %v845_v24, %s1203_s2 }
0x15e3   :  { %v368_v25 = vpop.permute.xlu0 %367 }
0x15e4   :  { %371 = vst.msk [vmem:[#allocation13 + $0x8] sm:$0xff] %vm81_vm2, %v368_v25 }
0x15e7   :  { %v528_v26 = vpop.permute.xlu0 %527 }
0x15e8   :  { %531 = vst.msk [vmem:[#allocation13 + $0x18] sm:$0xff] %vm81_vm2, %v528_v26 }
0x15eb   :  { %v688_v14 = vpop.permute.xlu0 %687 }
0x15ec   :  { %691 = vst.msk [vmem:[#allocation13 + $0x28] sm:$0xff] %vm81_vm2, %v688_v14 }
0x1654   :  { %v848_v3 = vpop.permute.xlu0 %847 }
0x1655   :  { %851 = vst.msk [vmem:[#allocation13 + $0x38] sm:$0xff] %vm81_vm2, %v848_v3  ;;  %852 = vst.msk [vmem:[#allocation2] sm:$0xff] %vm81_vm2, %v848_v3 }
0x1656   :  { %1178 = shalt.err (!%p1175_p8)
}
0x1657   :  { %s1179_s7 = scalar_lea.hbm %s1511_s6, 1024 }
0x1658   :  { %p1180_p9 = scmp.ne.s32.totalorder %s1511_s6, %s1179_s7  ;;  %p1183_p10 = scmp.lt.u32.totalorder %s1179_s7, %s1511_s6 }
0x165a   :  { %p1185_p11 = pnand %p1183_p10, %p1180_p9 }
0x165c   :  { %1188 = shalt.err (!%p1185_p11)
}
0x165d   :  { %865 = dma.vmem_to_hbm [thread:$0]  %s860_s27, 1024, %s1511_s6, [#allocation7], %s1199_s1, %s1199_s1, %s1200_s19  }
0x165e   :  { %1195 = dma.done.wait [#allocation7], 1024  }
0x165f   :  { %1196 = vsyncadd [#allocation7], 4294966272 }
0x1660   :  { %869 = vsyncpa [#allocation6], 1 }
0x1661   :  { %870 = vsyncpa [#allocation9], 1 }
0x1662   :  { %871 = vsyncpa [#allocation12], 1 }
0x1663   :  { %872 = vsyncpa [#allocation7], 1 }

</bundles_post_ra>
